<compile_context>
chip_gen: v7x
topology: tpu7x:2x2x1
jax: 0.10.0
libtpu: 0.0.40
codegen_flags: <defaults>
</compile_context>

<pallas_src>
import functools

import jax
import jax.numpy as jnp
from jax.experimental import pallas as pl
from jax.experimental.pallas import tpu as pltpu

_LANES = 128                           # vreg lane width — lane-dense stores
_WIDE_COLS = 1024                      # wider rows => fewer vld/vst per tile
_TARGET_TILE_BYTES = 4 * 1024 * 1024   # ~4 MiB / buffer (amortizes step cost on v7x HBM)
_MIN_SPLIT_BYTES = 1 * 1024 * 1024     # above this, force >=2 grid steps (megacore)
_VMEM_LIMIT_BYTES = 40 << 20           # explicit scoped-VMEM: safe on v5e/v6e/v7x


def _add_kernel(x_ref, p_ref, o_ref):
    # Up-cast both operands to f32 on the VPU (free: VALU slack on a DMA-bound
    # kernel), add, and round ONCE to the output dtype.  Doing the cast here
    # instead of the wrapper removes a whole extra HBM read+write of perturb
    # in the mixed-dtype case and avoids double rounding.
    o_ref[...] = (x_ref[...].astype(jnp.float32)
                  + p_ref[...].astype(jnp.float32)).astype(o_ref.dtype)


def _sublane_multiple(*dtypes):
    # Sublane packing: 8 rows for 32-bit, 16 for bf16/f16, 32 for int8/fp8.
    return max(max(8, 32 // jnp.dtype(d).itemsize) for d in dtypes)


def _pallas_add_2d(x2d, p2d, out_dtype, donate):
    """Elementwise add of two identically-shaped 2D arrays, tiled over rows."""
    rows, cols = x2d.shape
    out_dtype = jnp.dtype(out_dtype)
    mult = _sublane_multiple(x2d.dtype, p2d.dtype, out_dtype)

    widest = max(x2d.dtype.itemsize, p2d.dtype.itemsize, out_dtype.itemsize)
    bytes_per_row = cols * widest
    total_bytes = rows * bytes_per_row

    target_rows = max(mult, _TARGET_TILE_BYTES // max(bytes_per_row, 1))
    target_rows = max(mult, (target_rows // mult) * mult)

    if rows <= mult:
        block_rows = rows                    # full-extent block: layout-legal
    elif total_bytes > _MIN_SPLIT_BYTES:
        # Enough work to split: guarantee >= 2 grid steps so ("parallel",)
        # can shard across both v7x TensorCores, capped at the VMEM tile size.
        half_rows = max(mult, (((rows + 1) // 2) // mult) * mult)
        block_rows = min(target_rows, half_rows)
    else:
        # Small input: one full-extent block, no per-step overhead.
        block_rows = rows if rows <= target_rows else target_rows

    grid = (pl.cdiv(rows, block_rows),)
    spec = pl.BlockSpec((block_rows, cols), lambda i: (i, 0))

    bytes_accessed = rows * cols * (
        x2d.dtype.itemsize + p2d.dtype.itemsize + out_dtype.itemsize)
    cost = pl.CostEstimate(flops=rows * cols, transcendentals=0,
                           bytes_accessed=bytes_accessed)

    extra = {}
    if donate and x2d.dtype == out_dtype:
        # In-place writeback into batched_data's buffer.  Only effective when
        # the caller donates the argument (jax.jit donate_argnums); otherwise
        # XLA inserts a defensive copy that negates the saving.
        extra["input_output_aliases"] = {0: 0}

    return pl.pallas_call(
        _add_kernel,
        grid=grid,
        in_specs=[spec, spec],
        out_specs=spec,
        out_shape=jax.ShapeDtypeStruct((rows, cols), out_dtype),
        compiler_params=pltpu.CompilerParams(
            dimension_semantics=("parallel",),
            vmem_limit_bytes=_VMEM_LIMIT_BYTES,
        ),
        cost_estimate=cost,
        **extra,
    )(x2d, p2d)


def base_model_forward(batched_data, perturb=None, *, donate_input=False):
    """Pallas equivalent of the BaseModel.forward contract.

    Returns `batched_data` unchanged when `perturb is None`, otherwise
    `batched_data + perturb` (added in f32, rounded once to batched_data's
    dtype).

    donate_input=True aliases the kernel output onto batched_data's HBM buffer
    (2-read / 1-write traffic).  USE ONLY when the call is wrapped in
    jax.jit(..., donate_argnums=...) for batched_data and the caller never
    reuses the original array afterwards — otherwise XLA inserts a defensive
    copy and the aliasing buys nothing.
    """
    x = batched_data
    if perturb is None:
        # Identity path: skip the kernel entirely — no HBM round trip.
        return x

    assert perturb.shape == x.shape, "perturb must match batched_data shape"

    total = x.size
    if total % _LANES != 0:
        # Narrow / ragged lane case: a Pallas kernel with cols < 128 wastes
        # lanes and emits masked partial stores; plain XLA is already at the
        # HBM roofline here.  Still add in f32 and round once.
        return (x.astype(jnp.float32)
                + perturb.astype(jnp.float32)).astype(x.dtype)

    cols = _WIDE_COLS if total % _WIDE_COLS == 0 else _LANES
    x2d = x.reshape(total // cols, cols)
    p2d = perturb.reshape(total // cols, cols)

    out2d = _pallas_add_2d(x2d, p2d, x.dtype, donate_input)
    return out2d.reshape(x.shape)


if __name__ == "__main__":
    key = jax.random.PRNGKey(0)
    k1, k2 = jax.random.split(key)

    # Small shapes consistent with a graph-transformer "batched_data":
    # batch=2, nodes(seq)=8, hidden=32.
    B, N, D = 2, 8, 32
    x = jax.random.normal(k1, (B, N, D), dtype=jnp.float32)
    perturb = 0.01 * jax.random.normal(k2, (B, N, D), dtype=jnp.float32)

    # 1) Identity path (no perturb): pure pass-through, no kernel launch.
    y = jax.block_until_ready(base_model_forward(x))
    assert y.shape == x.shape and y.dtype == x.dtype
    assert jnp.allclose(y, x)

    # 2) Perturb path, default (no aliasing): Pallas lane-dense add kernel.
    y_p = jax.block_until_ready(base_model_forward(x, perturb))
    assert y_p.shape == x.shape and y_p.dtype == x.dtype
    assert jnp.allclose(y_p, x + perturb, atol=1e-6)

    # 3) Mixed dtype: bf16 activations + f32 perturb — cast/round once in-kernel.
    x_bf16 = x.astype(jnp.bfloat16)
    y_mix = jax.block_until_ready(base_model_forward(x_bf16, perturb))
    ref_mix = (x_bf16.astype(jnp.float32) + perturb).astype(jnp.bfloat16)
    assert y_mix.dtype == jnp.bfloat16
    assert jnp.allclose(y_mix.astype(jnp.float32),
                        ref_mix.astype(jnp.float32), atol=1e-2)

    # 4) Donation-backed in-place path: output aliases the donated input buffer.
    expected = x + perturb
    x_copy = x + 0.0  # fresh buffer we are allowed to donate / overwrite
    add_inplace = jax.jit(
        functools.partial(base_model_forward, donate_input=True),
        donate_argnums=(0,))
    y_d = jax.block_until_ready(add_inplace(x_copy, perturb))
    assert jnp.allclose(y_d, expected, atol=1e-6)

    print("KERNEL_OK")
</pallas_src>

<mosaic_0001>
module attributes {stable_mosaic.version = 11 : i64} {
  func.func @_add_kernel(%arg0: i32, %arg1: memref<4x128xf32, #tpu.memory_space<vmem>>, %arg2: memref<4x128xf32, #tpu.memory_space<vmem>>, %arg3: memref<4x128xf32, #tpu.memory_space<vmem>>) attributes {dimension_semantics = [#tpu.dimension_semantics<parallel>], iteration_bounds = array<i64: 1>, scalar_prefetch = 0 : i64, scratch_operands = 0 : i64, tpu.core_type = #tpu.core_type<tc>, window_params = [{transform_indices = @transform_0, window_bounds = array<i64: 4, 128>}, {transform_indices = @transform_1, window_bounds = array<i64: 4, 128>}, {transform_indices = @transform_2, window_bounds = array<i64: 4, 128>}]} {
    %c0 = arith.constant 0 : index
    %c0_0 = arith.constant 0 : index
    %0 = vector.load %arg1[%c0, %c0_0] : memref<4x128xf32, #tpu.memory_space<vmem>>, vector<4x128xf32>
    %c0_1 = arith.constant 0 : index
    %c0_2 = arith.constant 0 : index
    %1 = vector.load %arg2[%c0_1, %c0_2] : memref<4x128xf32, #tpu.memory_space<vmem>>, vector<4x128xf32>
    %2 = arith.addf %0, %1 : vector<4x128xf32>
    %c0_3 = arith.constant 0 : index
    %c0_4 = arith.constant 0 : index
    %3 = vector.load %arg3[%c0_3, %c0_4] : memref<4x128xf32, #tpu.memory_space<vmem>>, vector<4x128xf32>
    tpu.vector_store %arg3[%c0_3, %c0_4], %2 {strides = array<i32>} : memref<4x128xf32, #tpu.memory_space<vmem>>, vector<4x128xf32>,
    return
  }
  func.func @transform_0(%arg0: i32) -> (i32, i32) {
    %c0_i32 = arith.constant 0 : i32
    %c0_i32_0 = arith.constant 0 : i32
    return %arg0, %c0_i32 : i32, i32
  }
  func.func @transform_1(%arg0: i32) -> (i32, i32) {
    %c0_i32 = arith.constant 0 : i32
    %c0_i32_0 = arith.constant 0 : i32
    return %arg0, %c0_i32 : i32, i32
  }
  func.func @transform_2(%arg0: i32) -> (i32, i32) {
    %c0_i32 = arith.constant 0 : i32
    %c0_i32_0 = arith.constant 0 : i32
    return %arg0, %c0_i32 : i32, i32
  }
}

</mosaic_0001>

<bundles_post_ra>
// kernel: tpu_custom_call.1
= control target key start
LH: loop header
LB: loop body
LE: loop exit
PB: predicated region body
PF: predicated region fallthrough
CT: control target
= control target key end

     0   :  { %7 = vsyncpa [#allocation3], 0  ;;  %s185_s0 = inlined_call_operand.hbm [shape: f32[4,128], index: 0, kind: input, shape index: {}]   ;;  %s186_s1 = inlined_call_operand.hbm [shape: f32[4,128], index: 1, kind: input, shape index: {}]   ;;  %s187_s2 = inlined_call_operand.hbm [shape: f32[4,128], index: 2, kind: output, shape index: {}]  }
   0x1   :  { %8 = vsyncpa [#allocation6], 0 }
   0x2   :  { %9 = vsyncpa [#allocation4], 0  ;;  %s131_s9 = smov [#allocation2]   ;;  %s132_s11 = smov [#allocation5]  }
   0x3   :  { %s16_s10 = sshll.u32 %s131_s9, 4  ;;  %s26_s12 = sshll.u32 %s132_s11, 4  ;;  %s17_s10 = int_to_ptr.vmem [resolvable:$true] %s16_s10  ;;  %s27_s12 = int_to_ptr.vmem [resolvable:$true] %s26_s12 }
   0x4   :  { %s59_s15 = scalar_lea.hbm %s185_s0, 64 }
   0x5   :  { %p60_p0 = scmp.ne.s32.totalorder %s185_s0, %s59_s15  ;;  %p63_p1 = scmp.lt.u32.totalorder %s59_s15, %s185_s0 }
   0x7   :  { %p65_p2 = pnand %p63_p1, %p60_p0 }
   0x9   :  { %68 = shalt.err (!%p65_p2)
}
   0xa   :  { %s69_s20 = scalar_lea.vmem %s17_s10, 64  ;;  %p74_p4 = scmp.lt.s32.totalorder %s17_s10, %s17_s10 }
   0xb   :  { %p70_p3 = scmp.ne.s32.totalorder %s17_s10, %s69_s20  ;;  %p75_p5 = scmp.lt.s32.totalorder %s69_s20, %s69_s20 }
   0xd   :  { %p76_p6 = por %p75_p5, %p74_p4 }
   0xf   :  { %p77_p7 = pnand %p76_p6, %p70_p3 }
  0x11   :  { %80 = shalt.err (!%p77_p7)
}
  0x12   :  { %19 = dma.hbm_to_vmem [thread:$0]  %s185_s0, 64, %s17_s10, [#allocation3]  }
  0x13   :  { %s81_s25 = scalar_lea.hbm %s186_s1, 64 }
  0x14   :  { %p82_p8 = scmp.ne.s32.totalorder %s186_s1, %s81_s25  ;;  %p85_p9 = scmp.lt.u32.totalorder %s81_s25, %s186_s1 }
  0x16   :  { %p87_p10 = pnand %p85_p9, %p82_p8 }
  0x18   :  { %90 = shalt.err (!%p87_p10)
}
  0x19   :  { %s91_s30 = scalar_lea.vmem %s27_s12, 64  ;;  %p96_p12 = scmp.lt.s32.totalorder %s27_s12, %s27_s12 }
  0x1a   :  { %p92_p11 = scmp.ne.s32.totalorder %s27_s12, %s91_s30  ;;  %p97_p13 = scmp.lt.s32.totalorder %s91_s30, %s91_s30 }
  0x1c   :  { %p98_p0 = por %p97_p13, %p96_p12 }
  0x1e   :  { %p99_p1 = pnand %p98_p0, %p92_p11 }
  0x20   :  { %102 = shalt.err (!%p99_p1)
}
  0x21   :  { %29 = dma.hbm_to_vmem [thread:$0]  %s186_s1, 64, %s27_s12, [#allocation6]  }
  0x22   :  { %125 = dma.done.wait [#allocation3], 64  }
  0x23   :  { %126 = vsyncadd [#allocation3], 4294967232 }
  0x24   :  { %127 = dma.done.wait [#allocation6], 64  }
  0x25   :  { %128 = vsyncadd [#allocation6], 4294967232  ;;  %s133_s4 = smov [#allocation7]   ;;  %v36_v0 = vld [vmem:[#allocation2] sm:$0xf] }
  0x26   :  { %s46_s5 = sshll.u32 %s133_s4, 4  ;;  %v37_v1 = vld [vmem:[#allocation5] sm:$0xf]  ;;  %s47_s5 = int_to_ptr.vmem [resolvable:$true] %s46_s5 }
  0x27   :  { %v38_v2 = vadd.f32 %v37_v1, %v36_v0  ;;  %s103_s6 = scalar_lea.vmem %s47_s5, 64  ;;  %p108_p3 = scmp.lt.s32.totalorder %s47_s5, %s47_s5 }
  0x28   :  { %p104_p2 = scmp.ne.s32.totalorder %s47_s5, %s103_s6  ;;  %p109_p4 = scmp.lt.s32.totalorder %s103_s6, %s103_s6 }
  0x29   :  { %39 = vst [vmem:[#allocation7] sm:$0xf] %v38_v2 }
  0x2a   :  { %p110_p5 = por %p109_p4, %p108_p3 }
  0x2c   :  { %p111_p6 = pnand %p110_p5, %p104_p2 }
  0x2e   :  { %114 = shalt.err (!%p111_p6)
}
  0x2f   :  { %s115_s8 = scalar_lea.hbm %s187_s2, 64 }
  0x30   :  { %p116_p7 = scmp.ne.s32.totalorder %s187_s2, %s115_s8  ;;  %p119_p8 = scmp.lt.u32.totalorder %s115_s8, %s187_s2 }
  0x32   :  { %p121_p9 = pnand %p119_p8, %p116_p7 }
  0x34   :  { %124 = shalt.err (!%p121_p9)
}
  0x35   :  { %49 = dma.vmem_to_hbm [thread:$0]  %s47_s5, 64, %s187_s2, [#allocation4]  }
  0x36   :  { %129 = dma.done.wait [#allocation4], 64  }
  0x37   :  { %130 = vsyncadd [#allocation4], 4294967232 }
  0x38   :  { %53 = vsyncpa [#allocation3], 1 }
  0x39   :  { %54 = vsyncpa [#allocation6], 1 }
  0x3a   :  { %55 = vsyncpa [#allocation4], 1 }

</bundles_post_ra>
